<compile_context>
chip_gen: v7x
topology: tpu7x:2x2x1
jax: 0.10.0
libtpu: 0.0.40
codegen_flags: <defaults>
</compile_context>

<pallas_src>
import functools

import jax
import jax.numpy as jnp
from jax.experimental import pallas as pl
from jax.experimental.pallas import tpu as pltpu


def _round_up(x, m):
    return ((x + m - 1) // m) * m


def _choose_batch_tiling(batch, block_b, min_grid_steps):
    """Pick (tile_rows, padded_batch, n_tiles).

    n_tiles is chosen first (>= min_grid_steps when batch allows, and enough
    that each tile is <= block_b rows), then the tile size is derived, which
    bounds padding to <8 rows per tile.
    """
    b8 = _round_up(batch, 8)
    n_tiles = min(min_grid_steps, b8 // 8)          # never split below 8-row tiles
    n_tiles = max(1, n_tiles, pl.cdiv(b8, block_b))  # cap tile at block_b rows
    tb = _round_up(pl.cdiv(batch, n_tiles), 8)
    return tb, tb * n_tiles, n_tiles


def actor_kernel(state_ref, w1_ref, b1_ref, w2_ref, b2_ref, wh_ref, bh_ref,
                 out_ref, *, max_action, action_dim):
    # state is already bf16 (cast once in the wrapper); biases are f32.
    x = state_ref[...]

    # layer 1: ReLU(state @ W1 + b1)
    h1 = jnp.dot(x, w1_ref[...], preferred_element_type=jnp.float32) + b1_ref[...]
    h1 = jnp.maximum(h1, 0.0)

    # layer 2: ReLU(h1 @ W2 + b2)
    h2 = jnp.dot(h1.astype(w2_ref.dtype), w2_ref[...],
                 preferred_element_type=jnp.float32) + b2_ref[...]
    h2 = jnp.maximum(h2, 0.0)

    # fused heads: one matmul producing [mean_pre | log_std | zero-pad] lanes.
    heads = jnp.dot(h2.astype(wh_ref.dtype), wh_ref[...],
                    preferred_element_type=jnp.float32) + bh_ref[...]

    # Apply both nonlinearities over the full slab and select by lane index;
    # avoids sub-(8,128) slicing/concat inside the kernel.  Padding lanes are
    # finite garbage (tanh saturates, exp is clamped) and are sliced off in
    # the wrapper.
    col = jax.lax.broadcasted_iota(jnp.int32, heads.shape, dimension=1)
    mean_branch = max_action * jnp.tanh(heads)
    std_branch = jnp.exp(jnp.clip(heads, -20.0, 2.0))
    out_ref[...] = jnp.where(col < action_dim, mean_branch,
                             std_branch).astype(out_ref.dtype)


def actor_net_forward(state, kparams, action_dim, max_action=1.0,
                      block_b=512, min_grid_steps=2):
    """state: (B, state_dim) f32.

    kparams (from prepare_kernel_params):
      w1 (S,H) bf16, b1 (1,H) f32, w2 (H,H) bf16, b2 (1,H) f32,
      wh (H,P) bf16 fused+zero-padded head weight, bh (1,P) f32,
      with P = round_up(2*action_dim, 128).
    Returns (mean, std), each (B, action_dim) f32.
    """
    B, S = state.shape
    H = kparams["w1"].shape[1]
    P = kparams["wh"].shape[1]

    TB, Bp, n_tiles = _choose_batch_tiling(B, block_b, min_grid_steps)

    # bf16 state: halves the streamed HBM->VMEM bytes (MXU input is bf16 anyway).
    x = state.astype(jnp.bfloat16)
    if Bp != B:
        x = jnp.pad(x, ((0, Bp - B), (0, 0)))

    kernel = functools.partial(actor_kernel,
                               max_action=float(max_action),
                               action_dim=action_dim)

    # Constant index_map => weights stay resident in VMEM across grid steps.
    resident = lambda shape: pl.BlockSpec(shape, lambda i: (0, 0))

    out = pl.pallas_call(
        kernel,
        # bf16 output slab: lane-dense stores, half the HBM writeback bytes.
        out_shape=jax.ShapeDtypeStruct((Bp, P), jnp.bfloat16),
        grid=(n_tiles,),
        in_specs=[
            pl.BlockSpec((TB, S), lambda i: (i, 0)),   # state: streamed over batch
            resident((S, H)), resident((1, H)),        # W1, b1
            resident((H, H)), resident((1, H)),        # W2, b2
            resident((H, P)), resident((1, P)),        # fused+padded head W, b
        ],
        out_specs=pl.BlockSpec((TB, P), lambda i: (i, 0)),
        compiler_params=pltpu.CompilerParams(
            dimension_semantics=("parallel",)),
    )(x, kparams["w1"], kparams["b1"], kparams["w2"], kparams["b2"],
      kparams["wh"], kparams["bh"])

    mean = out[:B, :action_dim].astype(jnp.float32)
    std = out[:B, action_dim:2 * action_dim].astype(jnp.float32)
    return mean, std


def init_params(key, state_dim, action_dim, hidden_dim=128):
    """f32 'master' params mirroring the PyTorch module.

    Weights ~ N(0, 0.1) (as in the module's .normal_(0, 0.1)); biases keep
    PyTorch's default U(-1/sqrt(fan_in), 1/sqrt(fan_in)).  Weights are stored
    transposed vs. PyTorch, i.e. (in, out).
    """
    ks = jax.random.split(key, 8)

    def lin(kw, kb, fan_in, fan_out):
        w = 0.1 * jax.random.normal(kw, (fan_in, fan_out), jnp.float32)
        bound = 1.0 / float(fan_in) ** 0.5
        b = jax.random.uniform(kb, (1, fan_out), jnp.float32, -bound, bound)
        return w, b

    w1, b1 = lin(ks[0], ks[1], state_dim, hidden_dim)
    w2, b2 = lin(ks[2], ks[3], hidden_dim, hidden_dim)
    wm, bm = lin(ks[4], ks[5], hidden_dim, action_dim)
    ws, bs = lin(ks[6], ks[7], hidden_dim, action_dim)
    return dict(w1=w1, b1=b1, w2=w2, b2=b2, wm=wm, bm=bm, ws=ws, bs=bs)


def prepare_kernel_params(p, action_dim):
    """Fuse + lane-pad the two heads and cast matmul weights to bf16."""
    hidden_dim = p["w2"].shape[1]
    two_a = 2 * action_dim
    padded = _round_up(two_a, 128)

    wh = jnp.zeros((hidden_dim, padded), jnp.float32)
    wh = wh.at[:, :action_dim].set(p["wm"]).at[:, action_dim:two_a].set(p["ws"])
    bh = jnp.zeros((1, padded), jnp.float32)
    bh = bh.at[:, :action_dim].set(p["bm"]).at[:, action_dim:two_a].set(p["bs"])

    bf16 = lambda a: a.astype(jnp.bfloat16)
    return dict(w1=bf16(p["w1"]), b1=p["b1"], w2=bf16(p["w2"]), b2=p["b2"],
                wh=bf16(wh), bh=bh)


def actor_ref_f32(state, p, action_dim, max_action=1.0):
    """Pure-f32 reference == original PyTorch semantics."""
    h1 = jnp.maximum(state @ p["w1"] + p["b1"], 0.0)
    h2 = jnp.maximum(h1 @ p["w2"] + p["b2"], 0.0)
    mean = max_action * jnp.tanh(h2 @ p["wm"] + p["bm"])
    log_std = jnp.clip(h2 @ p["ws"] + p["bs"], -20.0, 2.0)
    return mean, jnp.exp(log_std)


def actor_ref_bf16(state, kp, action_dim, max_action=1.0):
    """Reference matching the kernel arithmetic (bf16 MXU inputs, f32 accumulate)."""
    h1 = jnp.maximum(
        jnp.dot(state.astype(jnp.bfloat16), kp["w1"],
                preferred_element_type=jnp.float32) + kp["b1"], 0.0)
    h2 = jnp.maximum(
        jnp.dot(h1.astype(jnp.bfloat16), kp["w2"],
                preferred_element_type=jnp.float32) + kp["b2"], 0.0)
    heads = jnp.dot(h2.astype(jnp.bfloat16), kp["wh"],
                    preferred_element_type=jnp.float32) + kp["bh"]
    mean = max_action * jnp.tanh(heads[:, :action_dim])
    log_std = jnp.clip(heads[:, action_dim:2 * action_dim], -20.0, 2.0)
    return mean, jnp.exp(log_std)


if __name__ == "__main__":
    # Small shapes; B=20 deliberately exercises multi-tile grid + row padding.
    B, STATE_DIM, ACTION_DIM, HIDDEN = 20, 16, 8, 128
    MAX_ACTION = 1.0

    key = jax.random.PRNGKey(0)
    k_state, k_params = jax.random.split(key)
    state = jax.random.normal(k_state, (B, STATE_DIM), jnp.float32)

    master = init_params(k_params, STATE_DIM, ACTION_DIM, HIDDEN)
    kparams = prepare_kernel_params(master, ACTION_DIM)

    mean, std = actor_net_forward(state, kparams, ACTION_DIM,
                                  max_action=MAX_ACTION)
    jax.block_until_ready((mean, std))

    assert mean.shape == (B, ACTION_DIM) and std.shape == (B, ACTION_DIM)

    # 1) Tight check vs. a reference that uses the same bf16-matmul arithmetic
    #    (residual delta is only the bf16 output store).
    mean_b, std_b = actor_ref_bf16(state, kparams, ACTION_DIM, MAX_ACTION)
    assert jnp.allclose(mean, mean_b, atol=1e-2, rtol=1e-2)
    assert jnp.allclose(std, std_b, atol=1e-2, rtol=1e-2)

    # 2) Looser check vs. the original f32 PyTorch semantics (bf16 weight /
    #    activation / output precision trade-off is deliberate).
    mean_f, std_f = actor_ref_f32(state, master, ACTION_DIM, MAX_ACTION)
    assert jnp.allclose(mean, mean_f, atol=5e-2, rtol=5e-2)
    assert jnp.allclose(std, std_f, atol=5e-2, rtol=5e-2)

    assert bool(jnp.all(std > 0.0))

    print("KERNEL_OK")
</pallas_src>

<mosaic_0001>
module attributes {stable_mosaic.version = 11 : i64} {
  func.func @actor_kernel(%arg0: i32, %arg1: memref<16x16xbf16, #tpu.memory_space<vmem>>, %arg2: memref<16x128xbf16, #tpu.memory_space<vmem>>, %arg3: memref<1x128xf32, #tpu.memory_space<vmem>>, %arg4: memref<128x128xbf16, #tpu.memory_space<vmem>>, %arg5: memref<1x128xf32, #tpu.memory_space<vmem>>, %arg6: memref<128x128xbf16, #tpu.memory_space<vmem>>, %arg7: memref<1x128xf32, #tpu.memory_space<vmem>>, %arg8: memref<16x128xbf16, #tpu.memory_space<vmem>>) attributes {dimension_semantics = [#tpu.dimension_semantics<parallel>], iteration_bounds = array<i64: 2>, scalar_prefetch = 0 : i64, scratch_operands = 0 : i64, tpu.core_type = #tpu.core_type<tc>, window_params = [{transform_indices = @transform_0, window_bounds = array<i64: 16, 16>}, {pipeline_mode = #tpu.pipeline_mode<synchronous>, transform_indices = @transform_1, window_bounds = array<i64: 16, 128>}, {pipeline_mode = #tpu.pipeline_mode<synchronous>, transform_indices = @transform_2, window_bounds = array<i64: 1, 128>}, {pipeline_mode = #tpu.pipeline_mode<synchronous>, transform_indices = @transform_3, window_bounds = array<i64: 128, 128>}, {pipeline_mode = #tpu.pipeline_mode<synchronous>, transform_indices = @transform_4, window_bounds = array<i64: 1, 128>}, {pipeline_mode = #tpu.pipeline_mode<synchronous>, transform_indices = @transform_5, window_bounds = array<i64: 128, 128>}, {pipeline_mode = #tpu.pipeline_mode<synchronous>, transform_indices = @transform_6, window_bounds = array<i64: 1, 128>}, {transform_indices = @transform_7, window_bounds = array<i64: 16, 128>}]} {
    %c0 = arith.constant 0 : index
    %c0_0 = arith.constant 0 : index
    %0 = vector.load %arg1[%c0, %c0_0] : memref<16x16xbf16, #tpu.memory_space<vmem>>, vector<16x16xbf16>
    %c0_1 = arith.constant 0 : index
    %c0_2 = arith.constant 0 : index
    %1 = vector.load %arg2[%c0_1, %c0_2] : memref<16x128xbf16, #tpu.memory_space<vmem>>, vector<16x128xbf16>
    %cst = arith.constant dense<0.000000e+00> : vector<16x128xf32>
    %2 = tpu.matmul %0, %1, %cst {dimension_numbers = #tpu.dot_dimension_numbers<[1], [0], [0], [1], [0, 0, 1, 1], [], []>} : vector<16x16xbf16>, vector<16x128xbf16>, vector<16x128xf32> -> vector<16x128xf32>
    %c0_3 = arith.constant 0 : index
    %c0_4 = arith.constant 0 : index
    %3 = vector.load %arg3[%c0_3, %c0_4] : memref<1x128xf32, #tpu.memory_space<vmem>>, vector<1x128xf32>
    %4 = vector.broadcast %3 : vector<1x128xf32> to vector<16x128xf32>
    %5 = arith.addf %2, %4 : vector<16x128xf32>
    %cst_5 = arith.constant 0.000000e+00 : f32
    %6 = vector.broadcast %cst_5 : f32 to vector<16x128xf32>
    %7 = arith.maximumf %5, %6 : vector<16x128xf32>
    %8 = arith.truncf %7 : vector<16x128xf32> to vector<16x128xbf16>
    %c0_6 = arith.constant 0 : index
    %c0_7 = arith.constant 0 : index
    %9 = vector.load %arg4[%c0_6, %c0_7] : memref<128x128xbf16, #tpu.memory_space<vmem>>, vector<128x128xbf16>
    %cst_8 = arith.constant dense<0.000000e+00> : vector<16x128xf32>
    %10 = tpu.matmul %8, %9, %cst_8 {dimension_numbers = #tpu.dot_dimension_numbers<[1], [0], [0], [1], [0, 0, 1, 1], [], []>} : vector<16x128xbf16>, vector<128x128xbf16>, vector<16x128xf32> -> vector<16x128xf32>
    %c0_9 = arith.constant 0 : index
    %c0_10 = arith.constant 0 : index
    %11 = vector.load %arg5[%c0_9, %c0_10] : memref<1x128xf32, #tpu.memory_space<vmem>>, vector<1x128xf32>
    %12 = vector.broadcast %11 : vector<1x128xf32> to vector<16x128xf32>
    %13 = arith.addf %10, %12 : vector<16x128xf32>
    %cst_11 = arith.constant 0.000000e+00 : f32
    %14 = vector.broadcast %cst_11 : f32 to vector<16x128xf32>
    %15 = arith.maximumf %13, %14 : vector<16x128xf32>
    %16 = arith.truncf %15 : vector<16x128xf32> to vector<16x128xbf16>
    %c0_12 = arith.constant 0 : index
    %c0_13 = arith.constant 0 : index
    %17 = vector.load %arg6[%c0_12, %c0_13] : memref<128x128xbf16, #tpu.memory_space<vmem>>, vector<128x128xbf16>
    %cst_14 = arith.constant dense<0.000000e+00> : vector<16x128xf32>
    %18 = tpu.matmul %16, %17, %cst_14 {dimension_numbers = #tpu.dot_dimension_numbers<[1], [0], [0], [1], [0, 0, 1, 1], [], []>} : vector<16x128xbf16>, vector<128x128xbf16>, vector<16x128xf32> -> vector<16x128xf32>
    %c0_15 = arith.constant 0 : index
    %c0_16 = arith.constant 0 : index
    %19 = vector.load %arg7[%c0_15, %c0_16] : memref<1x128xf32, #tpu.memory_space<vmem>>, vector<1x128xf32>
    %20 = vector.broadcast %19 : vector<1x128xf32> to vector<16x128xf32>
    %21 = arith.addf %18, %20 : vector<16x128xf32>
    %22 = tpu.iota {dimensions = array<i32: 1>} : vector<16x128xi32>
    %23 = math.tanh %21 : vector<16x128xf32>
    %cst_17 = arith.constant 1.000000e+00 : f32
    %24 = vector.broadcast %cst_17 : f32 to vector<16x128xf32>
    %25 = arith.mulf %24, %23 : vector<16x128xf32>
    %cst_18 = arith.constant -2.000000e+01 : f32
    %cst_19 = arith.constant 2.000000e+00 : f32
    %26 = vector.broadcast %cst_18 : f32 to vector<16x128xf32>
    %27 = arith.maximumf %26, %21 : vector<16x128xf32>
    %28 = vector.broadcast %cst_19 : f32 to vector<16x128xf32>
    %29 = arith.minimumf %28, %27 : vector<16x128xf32>
    %30 = math.exp %29 : vector<16x128xf32>
    %c8_i32 = arith.constant 8 : i32
    %31 = vector.broadcast %c8_i32 : i32 to vector<16x128xi32>
    %32 = arith.cmpi slt, %22, %31 : vector<16x128xi32>
    %33 = arith.select %32, %25, %30 : vector<16x128xi1>, vector<16x128xf32>
    %34 = arith.truncf %33 : vector<16x128xf32> to vector<16x128xbf16>
    %c0_20 = arith.constant 0 : index
    %c0_21 = arith.constant 0 : index
    %35 = vector.load %arg8[%c0_20, %c0_21] : memref<16x128xbf16, #tpu.memory_space<vmem>>, vector<16x128xbf16>
    tpu.vector_store %arg8[%c0_20, %c0_21], %34 {strides = array<i32>} : memref<16x128xbf16, #tpu.memory_space<vmem>>, vector<16x128xbf16>,
    return
  }
  func.func @transform_0(%arg0: i32) -> (i32, i32) {
    %c0_i32 = arith.constant 0 : i32
    %c0_i32_0 = arith.constant 0 : i32
    return %arg0, %c0_i32 : i32, i32
  }
  func.func @transform_1(%arg0: i32) -> (i32, i32) {
    %c0_i32 = arith.constant 0 : i32
    %c0_i32_0 = arith.constant 0 : i32
    %c0_i32_1 = arith.constant 0 : i32
    return %c0_i32, %c0_i32_0 : i32, i32
  }
  func.func @transform_2(%arg0: i32) -> (i32, i32) {
    %c0_i32 = arith.constant 0 : i32
    %c0_i32_0 = arith.constant 0 : i32
    %c0_i32_1 = arith.constant 0 : i32
    return %c0_i32, %c0_i32_0 : i32, i32
  }
  func.func @transform_3(%arg0: i32) -> (i32, i32) {
    %c0_i32 = arith.constant 0 : i32
    %c0_i32_0 = arith.constant 0 : i32
    %c0_i32_1 = arith.constant 0 : i32
    return %c0_i32, %c0_i32_0 : i32, i32
  }
  func.func @transform_4(%arg0: i32) -> (i32, i32) {
    %c0_i32 = arith.constant 0 : i32
    %c0_i32_0 = arith.constant 0 : i32
    %c0_i32_1 = arith.constant 0 : i32
    return %c0_i32, %c0_i32_0 : i32, i32
  }
  func.func @transform_5(%arg0: i32) -> (i32, i32) {
    %c0_i32 = arith.constant 0 : i32
    %c0_i32_0 = arith.constant 0 : i32
    %c0_i32_1 = arith.constant 0 : i32
    return %c0_i32, %c0_i32_0 : i32, i32
  }
  func.func @transform_6(%arg0: i32) -> (i32, i32) {
    %c0_i32 = arith.constant 0 : i32
    %c0_i32_0 = arith.constant 0 : i32
    %c0_i32_1 = arith.constant 0 : i32
    return %c0_i32, %c0_i32_0 : i32, i32
  }
  func.func @transform_7(%arg0: i32) -> (i32, i32) {
    %c0_i32 = arith.constant 0 : i32
    %c0_i32_0 = arith.constant 0 : i32
    return %arg0, %c0_i32 : i32, i32
  }
}

</mosaic_0001>

<bundles_post_ra>
// kernel: tpu_custom_call.1
= control target key start
LH: loop header
LB: loop body
LE: loop exit
PB: predicated region body
PF: predicated region fallthrough
CT: control target
= control target key end

     0   :  { %12 = vsyncpa [#allocation3], 0  ;;  %s1323_s0 = inlined_call_operand.vmem [shape: bf16[32,16], index: 0, kind: input, shape index: {}]   ;;  %s1324_s1 = inlined_call_operand.vmem [shape: bf16[16,128], index: 1, kind: input, shape index: {}]   ;;  %s1325_s2 = inlined_call_operand.vmem [shape: f32[1,128], index: 2, kind: input, shape index: {}]   ;;  %s1326_s3 = inlined_call_operand.hbm [shape: bf16[128,128], index: 3, kind: input, shape index: {}]   ;;  %s1327_s4 = inlined_call_operand.vmem [shape: f32[1,128], index: 4, kind: input, shape index: {}]   ;;  %s1328_s5 = inlined_call_operand.hbm [shape: bf16[128,128], index: 5, kind: input, shape index: {}]   ;;  %s1329_s6 = inlined_call_operand.vmem [shape: f32[1,128], index: 6, kind: input, shape index: {}]   ;;  %s1330_s7 = inlined_call_operand.hbm [shape: bf16[32,128], index: 7, kind: output, shape index: {}]  }
   0x1   :  { %13 = vsyncpa [#allocation6], 0 }
   0x2   :  { %14 = vsyncpa [#allocation4], 0 }
   0x3   :  { %16 = vsyncpa [#allocation4 + $0x1], 0  ;;  %s1114_s24 = smov 0   ;;  %s1116_s25 = smov 0  }
   0x4   :  { %s1118_s26 = smov 0   ;;  %s1120_s27 = smov 0  }
   0x5 LB: > { %s1135_s28 = sadd.s32 4294967295, %s1063_s27   ;;  %s731_s29 = sadd.s32 4294967294, %s1063_s27   ;;  %s1063_s27 = sphi %s1120_s27, %s1350_s27   ;;  %s1059_s26 = sphi %s1118_s26, %s1349_s26   ;;  %s1055_s25 = sphi %s1116_s25, %s1348_s25   ;;  %s1051_s24 = sphi %s1114_s24, %s1347_s24  }
   0x6   : > { %s1139_s30 = sadd.s32 1, %s1063_s27   ;;  %s181_s8 = sadd.s32 1, %s1059_s26 }
   0x7   : > { %s178_s9 = ssub.s32 %s1063_s27, %s1139_s30  ;;  %p191_p0 = scmp.ne.s32.totalorder %s1059_s26, %s1055_s25 }
   0x8   : > { %p179_p1 = scmp.eq.s32.totalorder %s178_s9, 0  ;;  %p192_p2 = scmp.eq.s32.totalorder %s1135_s28, 1 }
   0x9   : > { %p197_p3 = scmp.ne.s32.totalorder %s1055_s25, %s1051_s24  ;;  %p198_p4 = scmp.eq.s32.totalorder %s731_s29, 1 }
   0xa   : > { %s1150_s10 = scalar_select %p179_p1, %s1059_s26, %s181_s8  }
   0xb   : > { %p1152_p5 = por %p192_p2, %p191_p0  ;;  %p1156_p6 = por %p198_p4, %p197_p3 }
   0xc   : > { %1334 = sst [smem:[#allocation11_spill]] %s1150_s10  ;;  %p732_p7 = scmp.ge.s32.totalorder %s1063_s27, 1 }
   0xd   : > { %s1335_s11 = scalar_select %p1152_p5, 1, 0 }
   0xe   : > { %s1336_s12 = scalar_select %p1156_p6, 1, 0 }
   0xf   : > { %p205_p8 = scmp.lt.s32.totalorder %s1063_s27, 3  ;;  %p1331_p9 = scmp.eq.s32.totalorder %s1135_s28, 0 }
  0x10   : > { %s1065_s14 = smov [#allocation2]   ;;  %s1066_s17 = smov [#allocation5]  }
  0x11   : > { %p1163_p10 = pnand %p732_p7, %p205_p8  ;;  %s223_s15 = sshll.u32 %s1065_s14, 4  ;;  %s224_s15 = int_to_ptr.vmem [resolvable:$true] %s223_s15 }
  0x12   : > { %s239_s18 = sshll.u32 %s1066_s17, 4  ;;  %s937_s21 = scalar_lea.hbm %s1326_s3, 1024  ;;  %s1175_s18 = int_to_ptr.vmem [resolvable:$true] %s239_s18 }
  0x13   : > { %s1337_s13 = scalar_select %p1163_p10, 1, 0 }
  0x14   : > { %p855_p11 = pneg %p1163_p10  ;;  %p938_p13 = scmp.ne.s32.totalorder %s1326_s3, %s937_s21 }
  0x15   : > { %p944_p3 = scmp.lt.u32.totalorder %s937_s21, %s1326_s3 }
  0x16   : > { %p1171_p12 = pnand %p1331_p9, %p855_p11 }
  0x18   : > { %p939_p0 = pneg %p1171_p12 }
  0x1a   : > { %p940_p1 = pnand %p939_p0, %p938_p13 }
  0x1c   : > { %p941_p2 = pneg %p940_p1 }
  0x1e   : > { %p946_p4 = pnand %p944_p3, %p941_p2 }
  0x20   : > { %949 = shalt.err (!%p946_p4)
}
  0x21   : > { %s950_s9 = scalar_lea.vmem %s224_s15, 1024  ;;  %p958_p9 = scmp.lt.s32.totalorder %s224_s15, %s224_s15 }
  0x22   : > { %p951_p7 = scmp.ne.s32.totalorder %s224_s15, %s950_s9  ;;  %p959_p6 = scmp.lt.s32.totalorder %s950_s9, %s950_s9 }
  0x24   : > { %p953_p8 = pnand %p951_p7, %p939_p0  ;;  %p960_p5 = por %p959_p6, %p958_p9 }
  0x26   : > { %p954_p11 = pneg %p953_p8 }
  0x28   : > { %p961_p10 = pnand %p960_p5, %p954_p11 }
  0x2a   : > { %964 = shalt.err (!%p961_p10)
}
  0x2b   : > { %s1067_s14 = smov 64   ;;  %s1068_s17 = smov 4  }
  0x2c   : > { %858 = dma.hbm_to_vmem [thread:$0]  (!%p1171_p12), %s1326_s3, 1024, %s224_s15, [#allocation3], %s1067_s14, %s1067_s14, %s1068_s17  }
  0x2d   : > { %s965_s23 = scalar_lea.hbm %s1328_s5, 1024 }
  0x2e   : > { %p966_p13 = scmp.ne.s32.totalorder %s1328_s5, %s965_s23  ;;  %p972_p9 = scmp.lt.u32.totalorder %s965_s23, %s1328_s5 }
  0x30   : > { %p968_p5 = pnand %p966_p13, %p939_p0 }
  0x32   : > { %p969_p6 = pneg %p968_p5 }
  0x34   : > { %p974_p10 = pnand %p972_p9, %p969_p6 }
  0x36   : > { %977 = shalt.err (!%p974_p10)
}
  0x37   : > { %s978_s15 = scalar_lea.vmem %s1175_s18, 1024  ;;  %p986_p4 = scmp.lt.s32.totalorder %s1175_s18, %s1175_s18 }
  0x38   : > { %p979_p1 = scmp.ne.s32.totalorder %s1175_s18, %s978_s15  ;;  %p987_p7 = scmp.lt.s32.totalorder %s978_s15, %s978_s15 }
  0x3a   : > { %p981_p2 = pnand %p979_p1, %p939_p0  ;;  %p988_p8 = por %p987_p7, %p986_p4 }
  0x3c   : > { %p982_p3 = pneg %p981_p2 }
  0x3e   : > { %p989_p11 = pnand %p988_p8, %p982_p3 }
  0x40   : > { %992 = shalt.err (!%p989_p11)
}
  0x41   : > { %861 = dma.hbm_to_vmem [thread:$0]  (!%p1171_p12), %s1328_s5, 1024, %s1175_s18, [#allocation6], %s1067_s14, %s1067_s14, %s1068_s17  }
  0x42   : > { %p1339_p13 = scmp.ne.s32.totalorder %s1337_s13, 0 }
  0x43   : > { %p1340_p5 = scmp.eq.s32.totalorder (!%p1339_p13), %s1135_s28, 0 }
  0x44   : > { %267 = sbr.rel (%p1339_p13) target bundleno = 778 (0x30a), region = 48 }
  0x4b   : > { %1038 = dma.done.wait (%p1340_p5), [#allocation3], 1024   ;;  %p1341_p0 = pmov %p1340_p5 }
  0x4d   : > { %1040 = vsyncadd (%p1341_p0), [#allocation3], 4294966272  ;;  %p1342_p6 = pmov %p1341_p0 }
  0x4e   : > { %p1343_p9 = pmov %p1341_p0 }
  0x4f   : > { %1042 = dma.done.wait (%p1342_p6), [#allocation6], 1024  }
  0x50   : > { %1044 = vsyncadd (%p1343_p9), [#allocation6], 4294966272  ;;  %s740_s16 = sshll.u32 %s1135_s28, 1  ;;  %v1069_v0 = vmov 0.0   ;;  %vm1070_vm0 = vmmov 0   ;;  %v911_v1 = vld [vmem:[%s1324_s1] sm:$0xff]   ;;  %v608_v52 = vlaneseq }
  0x51   : > { %799 = vmatprep.subr.bf16.mxu0 %v1069_v0  ;;  %801 = vmatprep.mubr.msk.bf16.mxu0 %vm1070_vm0, %v1069_v0  ;;  %p304_p12 = scmp.lt.s32.totalorder %s740_s16, 3  ;;  %vm333_vm1 = vcmask 130048   ;;  %v913_v3 = vld [vmem:[#allocation2] sm:$0xff]   ;;  %v914_v4 = vld [vmem:[#allocation2 + $0x8] sm:$0xff]   ;;  %v915_v5 = vld [vmem:[#allocation2 + $0x10] sm:$0xff]   ;;  %s300_s10 = sand.u32 1, %s1055_s25  }
  0x52   : > { %805 = vmatprep.subr.bf16.mxu1 %v1069_v0  ;;  %821 = vmatprep.mubr.msk.bf16.mxu1 %vm1070_vm0, %v1069_v0  ;;  %v916_v6 = vld [vmem:[#allocation2 + $0x18] sm:$0xff]   ;;  %v917_v7 = vld [vmem:[#allocation2 + $0x20] sm:$0xff]   ;;  %v918_v8 = vld [vmem:[#allocation2 + $0x28] sm:$0xff]   ;;  %s739_s19 = sshll.u32 %s300_s10, 3  ;;  %v609_v53 = vand.u32 127, %v608_v52  ;;  %s1282_s21 = scalar_lea.sflag [#allocation4], %s300_s10 }
  0x53   : > { %s1352_s16 = smov (!%p304_p12, %s740_s16), 3  ;;  %800 = vmatpush3.bf16.msra.mxu0 %v911_v1  ;;  %806 = vmatpush3.bf16.msra.mxu1 %v913_v3  ;;  %v919_v9 = vld [vmem:[#allocation2 + $0x30] sm:$0xff]   ;;  %v920_v10 = vld [vmem:[#allocation2 + $0x38] sm:$0xff]   ;;  %v921_v11 = vld [vmem:[#allocation5] sm:$0xff]   ;;  %p1344_p1 = scmp.ne.s32.totalorder %s1335_s11, 0 }
  0x54   : > { %s741_s13 = sshll.u32 %s1352_s16, 2  ;;  %825 = vmatprep.subr.bf16.mxu0 %v1069_v0  ;;  %807 = vmatprep.subr.bf16.mxu1 %v1069_v0  ;;  %v922_v12 = vld [vmem:[#allocation5 + $0x8] sm:$0xff]   ;;  %v923_v13 = vld [vmem:[#allocation5 + $0x10] sm:$0xff]   ;;  %v924_v14 = vld [vmem:[#allocation5 + $0x18] sm:$0xff]   ;;  %vm620_vm2 = vcmp.lt.s32.totalorder %v609_v53, 8  ;;  %s773_s16 = sshll.u32 %s1135_s28, 7 }
  0x55   : > { %s307_s17 = scalar_lea.vmem %s1323_s0, %s741_s13  ;;  %v925_v15 = vld [vmem:[#allocation5 + $0x20] sm:$0xff]   ;;  %v926_v16 = vld [vmem:[#allocation5 + $0x28] sm:$0xff]   ;;  %v927_v27 = vld [vmem:[#allocation5 + $0x30] sm:$0xff]   ;;  %s302_s13 = scalar_lea.vmem [#allocation7], %s739_s19 }
  0x56   : > { %v912_v2 = vld [vmem:[%s307_s17] sm:$0xff]   ;;  %v928_v28 = vld [vmem:[#allocation5 + $0x38] sm:$0xff]   ;;  %s647_s18 = sshll.u32 %s302_s13, 4  ;;  %s1278_s20 = scalar_lea.hbm %s1330_s7, %s773_s16  ;;  %s1280_s18 = int_to_ptr.vmem [resolvable:$true] %s647_s18 }
  0x57   : > { %802 = vmatmul.mubr.msk.bf16.vlgmr.msra.gmra.mrb[0].mxu0 %vm333_vm1, %v912_v2  ;;  %808 = vmatpush3.bf16.msra.mxu1 %v914_v4  ;;  %v742_v17 = vld [vmem:[%s1325_s2] ss:$0 sm:$0xff]  ;;  %s993_s28 = scalar_lea.vmem %s1280_s18, 128  ;;  %s1071_s22 = smov [#allocation7]  }
  0x58   : > { %841 = vmatprep.mubr.msk.bf16.mxu0 %vm1070_vm0, %v1069_v0  ;;  %809 = vmatprep.subr.bf16.mxu1 %v1069_v0  ;;  %v746_v29 = vld [vmem:[%s1327_s4] ss:$0 sm:$0xff]  ;;  %p994_p10 = scmp.ne.s32.totalorder %s1280_s18, %s993_s28  ;;  %s997_s23 = sshll.u32 %s1071_s22, 4  ;;  %s998_s23 = int_to_ptr.vmem [resolvable:$false] %s997_s23 }
  0x59   : > { %826 = vmatpush3.bf16.msra.mxu0 %v921_v11  ;;  %v755_v39 = vld [vmem:[%s1329_s6] ss:$0 sm:$0xff]  ;;  %s999_s29 = scalar_lea.vmem %s998_s23, 256  ;;  %p1000_p4 = scmp.lt.s32.totalorder %s1280_s18, %s998_s23 }
  0x5a   : > { %827 = vmatprep.subr.bf16.mxu0 %v1069_v0  ;;  %p995_p2 = pnand %p994_p10, %p1344_p1  ;;  %p1001_p7 = scmp.lt.s32.totalorder %s999_s29, %s993_s28 }
  0x5b   : > { %810 = vmatpush3.bf16.msra.mxu1 %v915_v5 }
  0x5c   : > { %811 = vmatprep.subr.bf16.mxu1 %v1069_v0  ;;  %p996_p3 = pneg %p995_p2  ;;  %p1002_p8 = por %p1001_p7, %p1000_p4 }
  0x5d   : > { %828 = vmatpush3.bf16.msra.mxu0 %v922_v12 }
  0x5e   : > { %829 = vmatprep.subr.bf16.mxu0 %v1069_v0  ;;  %p1003_p11 = pnand %p1002_p8, %p996_p3 }
  0x5f   : > { %812 = vmatpush3.bf16.msra.mxu1 %v916_v6 }
  0x60   : > { %813 = vmatprep.subr.bf16.mxu1 %v1069_v0 }
  0x61   : > { %830 = vmatpush3.bf16.msra.mxu0 %v923_v13 }
  0x62   : > { %831 = vmatprep.subr.bf16.mxu0 %v1069_v0 }
  0x63   : > { %814 = vmatpush3.bf16.msra.mxu1 %v917_v7 }
  0x64   : > { %815 = vmatprep.subr.bf16.mxu1 %v1069_v0 }
  0x65   : > { %832 = vmatpush3.bf16.msra.mxu0 %v924_v14 }
  0x66   : > { %833 = vmatprep.subr.bf16.mxu0 %v1069_v0 }
  0x67   : > { %816 = vmatpush3.bf16.msra.mxu1 %v918_v8 }
  0x68   : > { %817 = vmatprep.subr.bf16.mxu1 %v1069_v0 }
  0x69   : > { %834 = vmatpush3.bf16.msra.mxu0 %v925_v15 }
  0x6a   : > { %835 = vmatprep.subr.bf16.mxu0 %v1069_v0 }
  0x6b   : > { %818 = vmatpush3.bf16.msra.mxu1 %v919_v9 }
  0x6c   : > { %819 = vmatprep.subr.bf16.mxu1 %v1069_v0 }
  0x6d   : > { %836 = vmatpush3.bf16.msra.mxu0 %v926_v16 }
  0x6e   : > { %837 = vmatprep.subr.bf16.mxu0 %v1069_v0 }
  0x6f   : > { %820 = vmatpush3.bf16.msra.mxu1 %v920_v10 }
  0x71   : > { %838 = vmatpush3.bf16.msra.mxu0 %v927_v27 }
  0x72   : > { %839 = vmatprep.subr.bf16.mxu0 %v1069_v0 }
  0x75   : > { %840 = vmatpush3.bf16.msra.mxu0 %v928_v28 }
 0x12a   : > { %v371_v18 = vpop.f32.mrb[0].mxu0 }
 0x12b   : > { %v372_v19 = vadd.f32 %v742_v17, %v371_v18  ;;  %v803_v20 = vpop.f32.mrb[1].mxu0 }
 0x12c   : > { %v374_v21 = vpop.f32.mrb[2].mxu0 }
 0x12d   : > { %v375_v22 = vadd.f32 %v742_v17, %v374_v21  ;;  %v804_v23 = vpop.f32.mrb[3].mxu0  ;;  %v378_v24 = vmax.f32 %v372_v19, 0.0 }
 0x12f   : > { %v379_v25 = vmax.f32 %v375_v22, 0.0 }
 0x131   : > { %v380_v26 = vpack.c.bf16 %v379_v25, %v378_v24 }
 0x133   : > { %822 = vmatmul.mubr.bf16.vlgmr.msra.gmra.mrb[0].mxu1 %v380_v26 }
 0x206   : > { %v486_v30 = vpop.f32.mrb[0].mxu1 }
 0x207   : > { %v487_v31 = vadd.f32 %v746_v29, %v486_v30  ;;  %v823_v32 = vpop.f32.mrb[1].mxu1 }
 0x208   : > { %v489_v33 = vpop.f32.mrb[2].mxu1 }
 0x209   : > { %v490_v34 = vadd.f32 %v746_v29, %v489_v33  ;;  %v824_v35 = vpop.f32.mrb[3].mxu1  ;;  %v493_v36 = vmax.f32 %v487_v31, 0.0 }
 0x20b   : > { %v494_v37 = vmax.f32 %v490_v34, 0.0 }
 0x20d   : > { %v495_v38 = vpack.c.bf16 %v494_v37, %v493_v36 }
 0x20f   : > { %842 = vmatmul.mubr.bf16.vlgmr.msra.gmra.mrb[4].mxu0 %v495_v38 }
 0x2e2   : > { %v601_v40 = vpop.f32.mrb[4].mxu0 }
 0x2e3   : > { %v602_v41 = vadd.f32 %v755_v39, %v601_v40  ;;  %v843_v42 = vpop.f32.mrb[5].mxu0 }
 0x2e4   : > { %v604_v43 = vpop.f32.mrb[6].mxu0 }
 0x2e5   : > { %v612_v44 = vmax.f32 %v602_v41, -20.0  ;;  %v605_v45 = vadd.f32 %v755_v39, %v604_v43  ;;  %v844_v46 = vpop.f32.mrb[7].mxu0  ;;  %929 = vtanh.f32 %v602_v41 }
 0x2e7   : > { %v614_v47 = vmin.f32 %v612_v44, 2.0  ;;  %v613_v48 = vmax.f32 %v605_v45, -20.0 }
 0x2e9   : > { %v616_v49 = vmul.f32 1.442695, %v614_v47  ;;  %v615_v50 = vmin.f32 %v613_v48, 2.0 }
 0x2eb   : > { %931 = vpow2.f32 %v616_v49  ;;  %v618_v51 = vmul.f32 1.442695, %v615_v50 }
 0x2ec   : > { %933 = vtanh.f32 %v605_v45 }
 0x2ed   : > { %935 = vpow2.f32 %v618_v51 }
 0x2ef   : > { %v930_v54 = vpop.eup %929 }
 0x2f5   : > { %v932_v55 = vpop.eup %931 }
 0x2f6   : > { %v934_v56 = vpop.eup %933  ;;  %v621_v58 = vsel %vm620_vm2, %v930_v54, %v932_v55 }
 0x2f7   : > { %v936_v57 = vpop.eup %935 }
 0x2f8   : > { %v622_v59 = vsel %vm620_vm2, %v934_v56, %v936_v57 }
 0x2f9   : > { %v777_v60 = vpack.c.bf16 %v622_v59, %v621_v58 }
 0x2fb   : > { %778 = vst [vmem:[%s302_s13] sm:$0xff] %v777_v60  }
 0x2fc   : > { %1006 = shalt.err (!%p1003_p11)
}
 0x2fd   : > { %s1007_s8 = scalar_lea.hbm %s1278_s20, 128  ;;  %s1011_s10 = scalar_lea.hbm %s1330_s7, 256 }
 0x2fe   : > { %p1008_p13 = scmp.ne.s32.totalorder %s1278_s20, %s1007_s8  ;;  %p1012_p6 = scmp.lt.u32.totalorder %s1278_s20, %s1330_s7 }
 0x2ff   : > { %p1013_p9 = scmp.lt.u32.totalorder %s1011_s10, %s1007_s8  ;;  %p1015_p10 = scmp.lt.u32.totalorder %s1007_s8, %s1278_s20 }
 0x300   : > { %p1009_p5 = pnand %p1008_p13, %p1344_p1 }
 0x301   : > { %p1014_p12 = por %p1013_p9, %p1012_p6 }
 0x302   : > { %p1010_p0 = pneg %p1009_p5 }
 0x303   : > { %p1016_p2 = por %p1015_p10, %p1014_p12 }
 0x305   : > { %p1017_p3 = pnand %p1016_p2, %p1010_p0 }
 0x307   : > { %1020 = shalt.err (!%p1017_p3)
}
 0x308   : > { %s1072_s13 = smov 64   ;;  %s1073_s14 = smov 4  }
 0x309   : > { %853 = dma.vmem_to_hbm [thread:$0]  (%p1344_p1), %s1280_s18, 128, %s1278_s20, %s1282_s21, %s1072_s13, %s1072_s13, %s1073_s14  }
 0x30a PF: > { %p870_p4 = scmp.ge.s32.totalorder %s1063_s27, 2  ;;  %s662_s17 = sand.u32 1, %s1051_s24  }
 0x30b   : > { %p1345_p7 = scmp.ne.s32.totalorder %s1336_s12, 0  ;;  %s663_s28 = scalar_lea.sflag [#allocation4], %s662_s17 }
 0x30d   : > { %p863_p8 = pnand %p870_p4, %p1345_p7 }
 0x30f   : > { %1046 = dma.done.wait (!%p863_p8), %s663_s28, 128  }
 0x310   : > { %1048 = vsyncadd (!%p863_p8), %s663_s28, 4294967168  ;;  %s1346_s22 = sld [smem:[#allocation11_spill]]  ;;  %p19_p11 = scmp.ge.s32.totalorder %s1139_s30, 4  }
 0x311   : > { %s1347_s24 = smov %s1055_s25  ;;  %s1348_s25 = smov %s1059_s26 }
 0x312   : > { %s1350_s27 = smov %s1139_s30  ;;  %21 = sbr.rel (!%p19_p11) target bundleno = 5 (0x5), region = 92 }
 0x316   : > { %s1349_s26 = smov %s1346_s22 }
 0x319   :  { %668 = vsyncpa [#allocation3], 1 }
 0x31a   :  { %670 = vsyncpa [#allocation3 + $0x1], 1 }
 0x31b   :  { %671 = vsyncpa [#allocation6], 1 }
 0x31c   :  { %672 = vsyncpa [#allocation4], 1 }
 0x31d   :  { %674 = vsyncpa [#allocation4 + $0x1], 1 }

</bundles_post_ra>
